<compile_context>
chip_gen: v5e
topology: v5e:2x2
jax: 0.10.0
libtpu: 0.0.40
codegen_flags: <defaults>
</compile_context>

<pallas_src>
import jax
import jax.numpy as jnp
from jax.experimental import pallas as pl
from jax.experimental.pallas import tpu as pltpu


def fraud_kernel(x_ref, w_ref, b_ref, o_ref):
    # x_ref: (TB, F) VMEM (streamed); w_ref: (1, F) VMEM (resident across steps);
    # b_ref: (1,) f32 SMEM scalar; o_ref: (1, 1, TB) f32 VMEM (lane-dense slab).
    #
    # Lane-dense logits: contract the feature dim of w (1, F) with the feature
    # dim of x (TB, F) -> (1, TB).  TB maps to lanes, so the bias add, sigmoid
    # and the store all run at full 128-lane vreg utilization.
    z = jax.lax.dot_general(
        w_ref[...], x_ref[...],
        dimension_numbers=(((1,), (1,)), ((), ())),
        preferred_element_type=jnp.float32,
    ) + b_ref[0]
    o_ref[0] = jax.nn.sigmoid(z).astype(o_ref.dtype)


def _round_up(n, m):
    return ((n + m - 1) // m) * m


def fraud_detector(x, weight, bias, *, tb=8192):
    """sigmoid(x @ weight.T + bias).

    x: (B, F) f32 or bf16, weight: (1, F), bias: (1,)  ->  (B, 1) f32 probs.
    """
    B, F = x.shape
    w = weight.reshape(1, F).astype(x.dtype)      # match MXU operand dtype (bf16-ready)
    b = bias.reshape(1).astype(jnp.float32)       # SMEM scalar

    # Batch tile: multiple of 8 sublanes, default 8192 rows (~4 MiB f32 tile,
    # ~8 MiB double-buffered).
    TB = min(tb, _round_up(B, 8))
    # On big batches keep >= ~8 grid steps so the "parallel" axis can be
    # sharded across TensorCores (v7x) with pipeline depth; floor at 2048 rows
    # (~1 MiB tiles) so per-step overhead stays amortized.
    if B >= 16 * 1024:
        TB = min(TB, max(2048, _round_up(pl.cdiv(B, 8), 8)))
    num_tiles = pl.cdiv(B, TB)

    itemsize = x.dtype.itemsize
    out = pl.pallas_call(
        fraud_kernel,
        out_shape=jax.ShapeDtypeStruct((num_tiles, 1, TB), jnp.float32),
        grid=(num_tiles,),
        in_specs=[
            pl.BlockSpec((TB, F), lambda i: (i, 0)),            # x: streamed, unpadded
            pl.BlockSpec((1, F), lambda i: (0, 0)),             # weight: VMEM-resident
            pl.BlockSpec(memory_space=pltpu.MemorySpace.SMEM),  # bias: SMEM scalar
        ],
        out_specs=pl.BlockSpec((1, 1, TB), lambda i: (i, 0, 0)),
        compiler_params=pltpu.CompilerParams(
            dimension_semantics=("parallel",),
        ),
        cost_estimate=pl.CostEstimate(
            flops=2 * B * F,
            transcendentals=B,
            bytes_accessed=B * F * itemsize + F * itemsize + B * 4 + 4,
        ),
    )(x, w, b)

    # (num_tiles, 1, TB) lane-dense slab -> (B, 1).  Rows >= B in the last
    # (partial) tile came from out-of-bounds reads; they are discarded here.
    return out.reshape(num_tiles * TB)[:B].reshape(B, 1)


if __name__ == "__main__":
    INPUT_SIZE = 121

    key = jax.random.PRNGKey(0)
    kx, kw, kb, kx2, kx3 = jax.random.split(key, 5)

    # Parameter init mimicking nn.Linear default: U(-1/sqrt(F), 1/sqrt(F)).
    bound = 1.0 / float(jnp.sqrt(jnp.float32(INPUT_SIZE)))
    weight = jax.random.uniform(kw, (1, INPUT_SIZE), jnp.float32, -bound, bound)
    bias = jax.random.uniform(kb, (1,), jnp.float32, -bound, bound)

    def ref_fn(xv):
        return jax.nn.sigmoid(xv.astype(jnp.float32) @ weight.T + bias)

    ok = True

    # Small canonical case (single tile).
    x = jax.random.normal(kx, (8, INPUT_SIZE), jnp.float32)
    out = fraud_detector(x, weight, bias)
    jax.block_until_ready(out)
    ok &= out.shape == (8, 1)
    ok &= bool(jnp.allclose(out, ref_fn(x), atol=1e-4))

    # Multi-tile grid with a partial last block (tb=64 -> 4 grid steps, B=200).
    x2 = jax.random.normal(kx2, (200, INPUT_SIZE), jnp.float32)
    out2 = fraud_detector(x2, weight, bias, tb=64)
    jax.block_until_ready(out2)
    ok &= out2.shape == (200, 1)
    ok &= bool(jnp.allclose(out2, ref_fn(x2), atol=1e-4))

    # bf16 activations (halves HBM traffic; accumulation stays f32 in-kernel).
    x3 = jax.random.normal(kx3, (13, INPUT_SIZE), jnp.float32)
    out3 = fraud_detector(x3.astype(jnp.bfloat16), weight, bias)
    jax.block_until_ready(out3)
    ok &= out3.shape == (13, 1)
    ok &= bool(jnp.allclose(out3, ref_fn(x3), atol=1e-2))

    assert ok, "mismatch vs reference"
    print("KERNEL_OK")
</pallas_src>

<mosaic_0001>
module attributes {stable_mosaic.version = 11 : i64} {
  func.func @fraud_kernel(%arg0: i32, %arg1: memref<8x121xf32, #tpu.memory_space<vmem>>, %arg2: memref<1x121xf32, #tpu.memory_space<vmem>>, %arg3: memref<1xf32, #tpu.memory_space<smem>>, %arg4: memref<1x1x8xf32, #tpu.memory_space<vmem>>) attributes {dimension_semantics = [#tpu.dimension_semantics<parallel>], iteration_bounds = array<i64: 1>, scalar_prefetch = 0 : i64, scratch_operands = 0 : i64, tpu.core_type = #tpu.core_type<tc>, window_params = [{transform_indices = @transform_0, window_bounds = array<i64: 8, 121>}, {pipeline_mode = #tpu.pipeline_mode<synchronous>, transform_indices = @transform_1, window_bounds = array<i64: 1, 121>}, {transform_indices = @transform_2, window_bounds = array<i64: 1>}, {transform_indices = @transform_3, window_bounds = array<i64: 1, 1, 8>}]} {
    %c0 = arith.constant 0 : index
    %c0_0 = arith.constant 0 : index
    %0 = vector.load %arg2[%c0, %c0_0] : memref<1x121xf32, #tpu.memory_space<vmem>>, vector<1x121xf32>
    %c0_1 = arith.constant 0 : index
    %c0_2 = arith.constant 0 : index
    %1 = vector.load %arg1[%c0_1, %c0_2] : memref<8x121xf32, #tpu.memory_space<vmem>>, vector<8x121xf32>
    %cst = arith.constant dense<0.000000e+00> : vector<1x8xf32>
    %2 = tpu.matmul %0, %1, %cst {dimension_numbers = #tpu.dot_dimension_numbers<[1], [1], [0], [0], [0, 0, 1, 0], [], []>} : vector<1x121xf32>, vector<8x121xf32>, vector<1x8xf32> -> vector<1x8xf32>
    %c0_3 = arith.constant 0 : index
    %3 = memref.load %arg3[%c0_3] : memref<1xf32, #tpu.memory_space<smem>>
    %4 = vector.broadcast %3 : f32 to vector<1x8xf32>
    %5 = arith.addf %2, %4 : vector<1x8xf32>
    %6 = arith.negf %5 : vector<1x8xf32>
    %7 = math.exp %6 : vector<1x8xf32>
    %cst_4 = arith.constant 1.000000e+00 : f32
    %8 = vector.broadcast %cst_4 : f32 to vector<1x8xf32>
    %9 = arith.addf %8, %7 : vector<1x8xf32>
    %10 = arith.divf %8, %9 : vector<1x8xf32>
    %c0_5 = arith.constant 0 : index
    %c0_6 = arith.constant 0 : index
    %c0_7 = arith.constant 0 : index
    %11 = vector.load %arg4[%c0_5, %c0_6, %c0_7] : memref<1x1x8xf32, #tpu.memory_space<vmem>>, vector<1x1x8xf32>
    %12 = vector.shape_cast %11 : vector<1x1x8xf32> to vector<1x8xf32>
    %13 = vector.shape_cast %10 : vector<1x8xf32> to vector<1x1x8xf32>
    tpu.vector_store %arg4[%c0_5, %c0_6, %c0_7], %13 {strides = array<i32>} : memref<1x1x8xf32, #tpu.memory_space<vmem>>, vector<1x1x8xf32>,
    return
  }
  func.func @transform_0(%arg0: i32) -> (i32, i32) {
    %c0_i32 = arith.constant 0 : i32
    %c0_i32_0 = arith.constant 0 : i32
    return %arg0, %c0_i32 : i32, i32
  }
  func.func @transform_1(%arg0: i32) -> (i32, i32) {
    %c0_i32 = arith.constant 0 : i32
    %c0_i32_0 = arith.constant 0 : i32
    %c0_i32_1 = arith.constant 0 : i32
    return %c0_i32, %c0_i32_0 : i32, i32
  }
  func.func @transform_2(%arg0: i32) -> i32 {
    %c0_i32 = arith.constant 0 : i32
    %c0_i32_0 = arith.constant 0 : i32
    return %c0_i32 : i32
  }
  func.func @transform_3(%arg0: i32) -> (i32, i32, i32) {
    %c0_i32 = arith.constant 0 : i32
    %c0_i32_0 = arith.constant 0 : i32
    %c0_i32_1 = arith.constant 0 : i32
    return %arg0, %c0_i32, %c0_i32_0 : i32, i32, i32
  }
}

</mosaic_0001>

<bundles_post_ra>
// kernel: tpu_custom_call.1
= control target key start
LH: loop header
LB: loop body
LE: loop exit
PB: predicated region body
PF: predicated region fallthrough
CT: control target
= control target key end

     0   :  { %9 = vsyncpa [#allocation4], 0  ;;  %s194_s0 = inlined_call_operand.hbm [shape: f32[8,121], index: 0, kind: input, shape index: {}]   ;;  %s195_s1 = inlined_call_operand.vmem [shape: f32[1,121], index: 1, kind: input, shape index: {}]   ;;  %s196_s2 = inlined_call_operand.<no memory space> [shape: f32[1], index: 2, kind: input, shape index: {}]   ;;  %s197_s3 = inlined_call_operand.hbm [shape: f32[1,1,8], index: 3, kind: output, shape index: {}]  }
   0x1   :  { %10 = vsyncpa [#allocation5], 0  ;;  %s16_s14 = sshll.u32 %s194_s0, 4  ;;  %s160_s15 = smov [#allocation3]   ;;  %s17_s14 = int_to_ptr.hbm [resolvable:$true] %s16_s14 }
   0x2   :  { %s18_s16 = sshll.u32 %s160_s15, 4  ;;  %s19_s16 = int_to_ptr.vmem [resolvable:$true] %s18_s16 }
   0x3   :  { %21 = dma.hbm_to_vmem [thread:$0]  %s17_s14, 128, %s19_s16, [#allocation4]  }
   0x4   :  { %156 = dma.done.wait [#allocation4], 128  }
   0x5   :  { %157 = vsyncadd [#allocation4], 4294967168  ;;  %vm34_vm0 = vcmask 990208   ;;  %v31_v0 = vld [vmem:[#allocation3] sm:$0xff]  ;;  %v33_v2 = vstv %s196_s2  ;;  %s161_s0 = smov [#allocation6]   ;;  %s89_s2 = sshll.u32 %s197_s3, 4  ;;  %s90_s2 = int_to_ptr.hbm [resolvable:$true] %s89_s2 }
   0x6   :  { %99 = vmatpush.xpose.msk.msra.mxu0 %vm34_vm0, %v31_v0  ;;  %v30_v1 = vld [vmem:[%s195_s1] sm:$0x1]  ;;  %s87_s1 = sshll.u32 %s161_s0, 4  ;;  %vm80_vm4 = vcmask 57344   ;;  %s88_s1 = int_to_ptr.vmem [resolvable:$true] %s87_s1 }
   0x9   :  { %100 = vmatmul.msk.f32.vlgmr.msra.gmra.mxu0 %vm34_vm0, %v30_v1 }
  0x86   :  { %v58_v3 = vpop.f32.mrf.mxu0 }
  0x87   :  { %v59_v4 = vadd.f32 %v58_v3, %v33_v2 }
  0x89   :  { %v101_v5 = vmul.f32 -1.442695, %v59_v4 }
  0x8b   :  { %104 = vpow2.f32 %v101_v5 }
  0x91   :  { %v105_v6 = vpop.eup %104 }
  0x92   :  { %v64_v7 = vadd.f32 1.0, %v105_v6 }
  0x94   :  { %106 = vrcp.f32 %v64_v7  ;;  %v76_v11 = vand.u32 2147483648, %v64_v7  ;;  %v74_v13 = vand.u32 2147483647, %v64_v7  ;;  %vm70_vm2 = vweird.f32 %v64_v7 }
  0x96   :  { %v77_v15 = vor.u32 1.1754944e-38, %v76_v11  ;;  %vm75_vm5 = vcmp.eq.f32.partialorder %v74_v13, 8.507059e+37 }
  0x9a   :  { %v107_v8 = vpop.eup %106 }
  0x9b   :  { %v66_v9 = vmul.f32 %v107_v8, %v64_v7  ;;  %vm71_vm1 = vweird.f32 %v107_v8 }
  0x9c   :  { %vm72_vm3 = vmor %vm70_vm2, %vm71_vm1 }
  0x9d   :  { %v67_v10 = vsub.f32 1.0, %v66_v9 }
  0x9f   :  { %v68_v12 = vmul.f32 %v107_v8, %v67_v10 }
  0xa1   :  { %v69_v14 = vadd.f32 %v107_v8, %v68_v12 }
  0xa3   :  { %v73_v16 = vsel %vm72_vm3, %v107_v8, %v69_v14 }
  0xa4   :  { %v78_v17 = vsel %vm75_vm5, %v77_v15, %v73_v16 }
  0xa5   :  { %81 = vst.msk [vmem:[#allocation6] sm:$0x1] %vm80_vm4, %v78_v17 }
  0xa6   :  { %92 = dma.vmem_to_hbm [thread:$0]  %s88_s1, 16, %s90_s2, [#allocation5]  }
  0xa7   :  { %158 = dma.done.wait [#allocation5], 16  }
  0xa8   :  { %159 = vsyncadd [#allocation5], 4294967280 }
  0xa9   :  { %97 = vsyncpa [#allocation4], 1 }
  0xaa   :  { %98 = vsyncpa [#allocation5], 1 }

</bundles_post_ra>
